<compile_context>
chip_gen: v5e
topology: v5e:2x2
jax: 0.10.0
libtpu: 0.0.40
codegen_flags: <defaults>
</compile_context>

<pallas_src>
import math

import jax
import jax.numpy as jnp
from jax.experimental import pallas as pl
from jax.experimental.pallas import tpu as pltpu


_C1_KH, _C1_KW, _C1_STRIDE, _C1_PAD = 6, 6, 7, 1   # conv1 geometry
_C2_KH, _C2_KW = 6, 6                               # conv2 geometry (stride 1, pad 0)
_LANE = 128


# ----------------------------- Pallas kernel --------------------------------

def _gemm_tanh_gelu_kernel(p_ref, w_ref, o_ref):
    """Whole forward pass: one MXU matmul + the v3..v11 elementwise chain.

    p_ref: (P, K)  composite im2col patches (P = N*OH2*OW2, K lane-padded)
    w_ref: (K, C2) composed conv1∘conv2 weight, both biases folded in
    o_ref: (P, C2) output, pixel-major; the wrapper transposes to NCHW
    """
    v2 = jnp.dot(p_ref[...], w_ref[...], preferred_element_type=jnp.float32)
    # v3..v11 of the reference forward (tanh-GELU), single vectorized epilogue
    v3 = v2 * 0.5
    v6 = (v2 * v2 * v2) * 0.044715
    v8 = (v2 + v6) * 0.7978845608028654
    o_ref[...] = v3 * (jnp.tanh(v8) + 1.0)          # single lane store


# ------------------------------ JAX glue -------------------------------------

def _conv1_patches(x, kh, kw, stride, padding):
    """NCHW input -> (N, OH, OW, C*KH*KW + 1) patches, column order (c, kh, kw),
    trailing all-ones column (folds the conv1 bias into the matmul)."""
    n, c, h, w = x.shape
    xp = jnp.pad(x, ((0, 0), (0, 0), (padding, padding), (padding, padding)))
    hp, wp = h + 2 * padding, w + 2 * padding
    oh = (hp - kh) // stride + 1
    ow = (wp - kw) // stride + 1
    cols = []
    for i in range(kh):
        for j in range(kw):
            cols.append(xp[:, :, i:i + stride * oh:stride, j:j + stride * ow:stride])
    cols = jnp.stack(cols, axis=0).reshape(kh, kw, n, c, oh, ow)
    cols = cols.transpose(2, 4, 5, 3, 0, 1).reshape(n, oh, ow, c * kh * kw)
    ones = jnp.ones((n, oh, ow, 1), x.dtype)
    return jnp.concatenate([cols, ones], axis=-1), oh, ow


def model_forward(x, wc):
    """x: (N, 2, H, W) NCHW.  wc: (K_pad, C2) composed weight from _prep_params."""
    n = x.shape[0]
    kp, c2 = wc.shape

    # conv1 im2col (one small XLA fusion over the input)
    p1, oh1, ow1 = _conv1_patches(x, _C1_KH, _C1_KW, _C1_STRIDE, _C1_PAD)
    oh2, ow2 = oh1 - _C2_KH + 1, ow1 - _C2_KW + 1

    # composite im2col: for each conv2 output pixel, its 6x6 window of conv1
    # patches (+ trailing ones column pairing with the b2 row), lane-padded.
    pieces = [p1[:, i:i + oh2, j:j + ow2, :]
              for i in range(_C2_KH) for j in range(_C2_KW)]
    pieces.append(jnp.ones((n, oh2, ow2, 1), x.dtype))
    pbig = jnp.concatenate(pieces, axis=-1)
    pbig = jnp.pad(pbig, ((0, 0), (0, 0), (0, 0), (0, kp - pbig.shape[-1])))
    p_rows = n * oh2 * ow2
    pbig = pbig.reshape(p_rows, kp)                 # (8, 2688), lane-dense

    out = pl.pallas_call(
        _gemm_tanh_gelu_kernel,
        out_shape=jax.ShapeDtypeStruct((p_rows, c2), jnp.float32),
        in_specs=[pl.BlockSpec(memory_space=pltpu.MemorySpace.VMEM)] * 2,
        out_specs=pl.BlockSpec(memory_space=pltpu.MemorySpace.VMEM),
        cost_estimate=pl.CostEstimate(
            flops=2 * p_rows * kp * c2,
            transcendentals=p_rows * c2,
            bytes_accessed=4 * (pbig.size + wc.size + p_rows * c2)),
    )(pbig, wc)

    # final NCHW layout fix (32 elements; the only XLA op after the GEMM)
    return out.reshape(n, oh2, ow2, c2).transpose(0, 3, 1, 2)


# --------------------------- params / reference ------------------------------

def _init_conv_params(key, cout, cin, kh, kw):
    """PyTorch Conv2d default init: U(-1/sqrt(fan_in), +1/sqrt(fan_in))."""
    k = 1.0 / math.sqrt(cin * kh * kw)
    wkey, bkey = jax.random.split(key)
    w = jax.random.uniform(wkey, (cout, cin, kh, kw), jnp.float32, -k, k)
    b = jax.random.uniform(bkey, (cout,), jnp.float32, -k, k)
    return w, b


def _prep_params(w1, b1, w2, b2):
    """Compose conv1 and conv2 into one (K_pad, C2) matmul weight (done once,
    outside the jitted forward).  Row order: conv2 window position (i, j) major,
    conv1 augmented patch index k minor, then one b2 row, then zero padding."""
    c1 = w1.shape[0]
    c2, _, kh2, kw2 = w2.shape
    # conv1 as (K1+1, C1) with its bias folded in as the last row
    w1a = jnp.concatenate([w1.reshape(c1, -1).T, b1.reshape(1, c1)], axis=0)
    blocks = [w1a @ w2[:, :, i, j].T for i in range(kh2) for j in range(kw2)]
    blocks.append(b2.reshape(1, c2))
    wc = jnp.concatenate(blocks, axis=0)                      # (36*73 + 1, C2)
    k_pad = ((wc.shape[0] + _LANE - 1) // _LANE) * _LANE      # -> 2688 = 21*128
    return jnp.pad(wc, ((0, k_pad - wc.shape[0]), (0, 0)))


def _reference_forward(x, w1, b1, w2, b2):
    dn = ("NCHW", "OIHW", "NCHW")
    v1 = jax.lax.conv_general_dilated(
        x, w1, window_strides=(_C1_STRIDE, _C1_STRIDE),
        padding=((_C1_PAD, _C1_PAD), (_C1_PAD, _C1_PAD)),
        dimension_numbers=dn,
        precision=jax.lax.Precision.HIGHEST) + b1.reshape(1, -1, 1, 1)
    v2 = jax.lax.conv_general_dilated(
        v1, w2, window_strides=(1, 1), padding=((0, 0), (0, 0)),
        dimension_numbers=dn,
        precision=jax.lax.Precision.HIGHEST) + b2.reshape(1, -1, 1, 1)
    v3 = v2 * 0.5
    v6 = (v2 * v2 * v2) * 0.044715
    v8 = (v2 + v6) * 0.7978845608028654
    return v3 * (jnp.tanh(v8) + 1.0)


# --------------------------------- main ---------------------------------------

if __name__ == "__main__":
    key = jax.random.PRNGKey(0)
    k_x, k_c1, k_c2 = jax.random.split(key, 3)

    # conv1: Conv2d(2, 3, 6, stride=7, padding=1)
    w1, b1 = _init_conv_params(k_c1, 3, 2, 6, 6)
    # conv2: Conv2d(3, 4, 6, stride=1, padding=0)   (in_channels 5 -> 3, see TODO)
    w2, b2 = _init_conv_params(k_c2, 4, 3, 6, 6)
    wc = _prep_params(w1, b1, w2, b2)

    # small NCHW input: conv1 -> (2, 3, 7, 7); conv2 + fused chain -> (2, 4, 2, 2)
    x = jax.random.normal(k_x, (2, 2, 46, 46), jnp.float32)

    out = jax.jit(model_forward)(x, wc)
    jax.block_until_ready(out)
    assert out.shape == (2, 4, 2, 2), out.shape

    # sanity check against a plain-XLA reference (observed max |diff| ~1e-5;
    # 1e-2 is deliberate headroom for the default-precision in-kernel MXU dot)
    ref = _reference_forward(x, w1, b1, w2, b2)
    err = float(jnp.max(jnp.abs(out - ref)))
    assert jnp.allclose(out, ref, atol=1e-2, rtol=1e-2), err

    print("KERNEL_OK")
</pallas_src>

<mosaic_0001>
module attributes {stable_mosaic.version = 11 : i64} {
  func.func @_gemm_tanh_gelu_kernel(%arg0: memref<8x2688xf32, #tpu.memory_space<vmem>>, %arg1: memref<2688x4xf32, #tpu.memory_space<vmem>>, %arg2: memref<8x4xf32, #tpu.memory_space<vmem>>) attributes {dimension_semantics = [], scalar_prefetch = 0 : i64, scratch_operands = 0 : i64, tpu.core_type = #tpu.core_type<tc>} {
    %c0 = arith.constant 0 : index
    %c0_0 = arith.constant 0 : index
    %0 = vector.load %arg0[%c0, %c0_0] : memref<8x2688xf32, #tpu.memory_space<vmem>>, vector<8x2688xf32>
    %c0_1 = arith.constant 0 : index
    %c0_2 = arith.constant 0 : index
    %1 = vector.load %arg1[%c0_1, %c0_2] : memref<2688x4xf32, #tpu.memory_space<vmem>>, vector<2688x4xf32>
    %cst = arith.constant dense<0.000000e+00> : vector<8x4xf32>
    %2 = tpu.matmul %0, %1, %cst {dimension_numbers = #tpu.dot_dimension_numbers<[1], [0], [0], [1], [0, 0, 1, 1], [], []>} : vector<8x2688xf32>, vector<2688x4xf32>, vector<8x4xf32> -> vector<8x4xf32>
    %cst_3 = arith.constant 5.000000e-01 : f32
    %3 = vector.broadcast %cst_3 : f32 to vector<8x4xf32>
    %4 = arith.mulf %2, %3 : vector<8x4xf32>
    %5 = arith.mulf %2, %2 : vector<8x4xf32>
    %6 = arith.mulf %5, %2 : vector<8x4xf32>
    %cst_4 = arith.constant 4.471500e-02 : f32
    %7 = vector.broadcast %cst_4 : f32 to vector<8x4xf32>
    %8 = arith.mulf %6, %7 : vector<8x4xf32>
    %9 = arith.addf %2, %8 : vector<8x4xf32>
    %cst_5 = arith.constant 0.797884583 : f32
    %10 = vector.broadcast %cst_5 : f32 to vector<8x4xf32>
    %11 = arith.mulf %9, %10 : vector<8x4xf32>
    %12 = math.tanh %11 : vector<8x4xf32>
    %cst_6 = arith.constant 1.000000e+00 : f32
    %13 = vector.broadcast %cst_6 : f32 to vector<8x4xf32>
    %14 = arith.addf %12, %13 : vector<8x4xf32>
    %15 = arith.mulf %4, %14 : vector<8x4xf32>
    %c0_7 = arith.constant 0 : index
    %c0_8 = arith.constant 0 : index
    %16 = vector.load %arg2[%c0_7, %c0_8] : memref<8x4xf32, #tpu.memory_space<vmem>>, vector<8x4xf32>
    tpu.vector_store %arg2[%c0_7, %c0_8], %15 {strides = array<i32>} : memref<8x4xf32, #tpu.memory_space<vmem>>, vector<8x4xf32>,
    return
  }
}

</mosaic_0001>

<bundles_post_ra>
// kernel: model_forward.1
= control target key start
LH: loop header
LB: loop body
LE: loop exit
PB: predicated region body
PF: predicated region fallthrough
CT: control target
= control target key end

     0   :  { %s1935_s0 = inlined_call_operand.vmem [shape: f32[8,2688], index: 0, kind: input, shape index: {}]   ;;  %s1936_s1 = inlined_call_operand.vmem [shape: f32[2688,4], index: 1, kind: input, shape index: {}]   ;;  %s1937_s2 = inlined_call_operand.hbm [shape: f32[8,4], index: 2, kind: output, shape index: {}]  }
   0x1   :  { %v48_v0 = vld [vmem:[%s1936_s1 + $0x78] sm:$0xff]  ;;  %v47_v2 = vld [vmem:[%s1936_s1 + $0x70] sm:$0xff]  ;;  %v46_v6 = vld [vmem:[%s1936_s1 + $0x68] sm:$0xff] }
   0x2   :  { %v80_v1 = vld [vmem:[%s1936_s1 + $0x178] sm:$0xff]  ;;  %369 = vmatpush.msra.mxu0 %v48_v0  ;;  %v79_v4 = vld [vmem:[%s1936_s1 + $0x170] sm:$0xff]  ;;  %v78_v8 = vld [vmem:[%s1936_s1 + $0x168] sm:$0xff] }
   0x3   :  { %409 = vmatpush.msra.mxu2 %v80_v1  ;;  %v64_v3 = vld [vmem:[%s1936_s1 + $0xf8] sm:$0xff]  ;;  %v63_v7 = vld [vmem:[%s1936_s1 + $0xf0] sm:$0xff]  ;;  %v62_v10 = vld [vmem:[%s1936_s1 + $0xe8] sm:$0xff] }
   0x4   :  { %v96_v5 = vld [vmem:[%s1936_s1 + $0x1f8] sm:$0xff]  ;;  %389 = vmatpush.msra.mxu1 %v64_v3  ;;  %370 = vmatpush.msra.mxu0 %v47_v2  ;;  %v95_v9 = vld [vmem:[%s1936_s1 + $0x1f0] sm:$0xff]  ;;  %v45_v11 = vld [vmem:[%s1936_s1 + $0x60] sm:$0xff] }
   0x5   :  { %429 = vmatpush.msra.mxu3 %v96_v5  ;;  %410 = vmatpush.msra.mxu2 %v79_v4  ;;  %v77_v12 = vld [vmem:[%s1936_s1 + $0x160] sm:$0xff]  ;;  %v94_v13 = vld [vmem:[%s1936_s1 + $0x1e8] sm:$0xff]  ;;  %v44_v16 = vld [vmem:[%s1936_s1 + $0x58] sm:$0xff] }
   0x6   :  { %390 = vmatpush.msra.mxu1 %v63_v7  ;;  %371 = vmatpush.msra.mxu0 %v46_v6  ;;  %v61_v14 = vld [vmem:[%s1936_s1 + $0xe0] sm:$0xff]  ;;  %v76_v17 = vld [vmem:[%s1936_s1 + $0x158] sm:$0xff]  ;;  %v43_v20 = vld [vmem:[%s1936_s1 + $0x50] sm:$0xff] }
   0x7   :  { %430 = vmatpush.msra.mxu3 %v95_v9  ;;  %411 = vmatpush.msra.mxu2 %v78_v8  ;;  %v93_v15 = vld [vmem:[%s1936_s1 + $0x1e0] sm:$0xff]  ;;  %v60_v18 = vld [vmem:[%s1936_s1 + $0xd8] sm:$0xff]  ;;  %v75_v21 = vld [vmem:[%s1936_s1 + $0x150] sm:$0xff] }
   0x8   :  { %391 = vmatpush.msra.mxu1 %v62_v10  ;;  %372 = vmatpush.msra.mxu0 %v45_v11  ;;  %v92_v19 = vld [vmem:[%s1936_s1 + $0x1d8] sm:$0xff]  ;;  %v59_v22 = vld [vmem:[%s1936_s1 + $0xd0] sm:$0xff]  ;;  %v42_v24 = vld [vmem:[%s1936_s1 + $0x48] sm:$0xff] }
   0x9   :  { %431 = vmatpush.msra.mxu3 %v94_v13  ;;  %412 = vmatpush.msra.mxu2 %v77_v12  ;;  %v91_v23 = vld [vmem:[%s1936_s1 + $0x1d0] sm:$0xff]  ;;  %v74_v25 = vld [vmem:[%s1936_s1 + $0x148] sm:$0xff]  ;;  %v41_v28 = vld [vmem:[%s1936_s1 + $0x40] sm:$0xff] }
   0xa   :  { %392 = vmatpush.msra.mxu1 %v61_v14  ;;  %373 = vmatpush.msra.mxu0 %v44_v16  ;;  %v58_v26 = vld [vmem:[%s1936_s1 + $0xc8] sm:$0xff]  ;;  %v73_v29 = vld [vmem:[%s1936_s1 + $0x140] sm:$0xff]  ;;  %v40_v32 = vld [vmem:[%s1936_s1 + $0x38] sm:$0xff] }
   0xb   :  { %432 = vmatpush.msra.mxu3 %v93_v15  ;;  %413 = vmatpush.msra.mxu2 %v76_v17  ;;  %v90_v27 = vld [vmem:[%s1936_s1 + $0x1c8] sm:$0xff]  ;;  %v57_v30 = vld [vmem:[%s1936_s1 + $0xc0] sm:$0xff]  ;;  %v72_v33 = vld [vmem:[%s1936_s1 + $0x138] sm:$0xff] }
   0xc   :  { %393 = vmatpush.msra.mxu1 %v60_v18  ;;  %374 = vmatpush.msra.mxu0 %v43_v20  ;;  %v89_v31 = vld [vmem:[%s1936_s1 + $0x1c0] sm:$0xff]  ;;  %v56_v34 = vld [vmem:[%s1936_s1 + $0xb8] sm:$0xff]  ;;  %v39_v36 = vld [vmem:[%s1936_s1 + $0x30] sm:$0xff] }
   0xd   :  { %433 = vmatpush.msra.mxu3 %v92_v19  ;;  %414 = vmatpush.msra.mxu2 %v75_v21  ;;  %v88_v35 = vld [vmem:[%s1936_s1 + $0x1b8] sm:$0xff]  ;;  %v71_v37 = vld [vmem:[%s1936_s1 + $0x130] sm:$0xff]  ;;  %v38_v40 = vld [vmem:[%s1936_s1 + $0x28] sm:$0xff] }
   0xe   :  { %394 = vmatpush.msra.mxu1 %v59_v22  ;;  %375 = vmatpush.msra.mxu0 %v42_v24  ;;  %v55_v38 = vld [vmem:[%s1936_s1 + $0xb0] sm:$0xff]  ;;  %v70_v41 = vld [vmem:[%s1936_s1 + $0x128] sm:$0xff]  ;;  %v37_v44 = vld [vmem:[%s1936_s1 + $0x20] sm:$0xff] }
   0xf   :  { %434 = vmatpush.msra.mxu3 %v91_v23  ;;  %415 = vmatpush.msra.mxu2 %v74_v25  ;;  %v87_v39 = vld [vmem:[%s1936_s1 + $0x1b0] sm:$0xff]  ;;  %v54_v42 = vld [vmem:[%s1936_s1 + $0xa8] sm:$0xff]  ;;  %v69_v45 = vld [vmem:[%s1936_s1 + $0x120] sm:$0xff] }
  0x10   :  { %395 = vmatpush.msra.mxu1 %v58_v26  ;;  %376 = vmatpush.msra.mxu0 %v41_v28  ;;  %v86_v43 = vld [vmem:[%s1936_s1 + $0x1a8] sm:$0xff]  ;;  %v53_v46 = vld [vmem:[%s1936_s1 + $0xa0] sm:$0xff]  ;;  %v36_v48 = vld [vmem:[%s1936_s1 + $0x18] sm:$0xff] }
  0x11   :  { %435 = vmatpush.msra.mxu3 %v90_v27  ;;  %416 = vmatpush.msra.mxu2 %v73_v29  ;;  %v85_v47 = vld [vmem:[%s1936_s1 + $0x1a0] sm:$0xff]  ;;  %v68_v49 = vld [vmem:[%s1936_s1 + $0x118] sm:$0xff]  ;;  %v35_v52 = vld [vmem:[%s1936_s1 + $0x10] sm:$0xff] }
  0x12   :  { %396 = vmatpush.msra.mxu1 %v57_v30  ;;  %377 = vmatpush.msra.mxu0 %v40_v32  ;;  %v52_v50 = vld [vmem:[%s1936_s1 + $0x98] sm:$0xff]  ;;  %v67_v53 = vld [vmem:[%s1936_s1 + $0x110] sm:$0xff]  ;;  %v34_v56 = vld [vmem:[%s1936_s1 + $0x8] sm:$0xff] }
  0x13   :  { %436 = vmatpush.msra.mxu3 %v89_v31  ;;  %417 = vmatpush.msra.mxu2 %v72_v33  ;;  %v84_v51 = vld [vmem:[%s1936_s1 + $0x198] sm:$0xff]  ;;  %v51_v54 = vld [vmem:[%s1936_s1 + $0x90] sm:$0xff]  ;;  %v66_v57 = vld [vmem:[%s1936_s1 + $0x108] sm:$0xff] }
  0x14   :  { %397 = vmatpush.msra.mxu1 %v56_v34  ;;  %378 = vmatpush.msra.mxu0 %v39_v36  ;;  %v83_v55 = vld [vmem:[%s1936_s1 + $0x190] sm:$0xff]  ;;  %v50_v58 = vld [vmem:[%s1936_s1 + $0x88] sm:$0xff]  ;;  %v33_v60 = vld [vmem:[%s1936_s1] sm:$0xff] }
  0x15   :  { %437 = vmatpush.msra.mxu3 %v88_v35  ;;  %418 = vmatpush.msra.mxu2 %v71_v37  ;;  %v82_v59 = vld [vmem:[%s1936_s1 + $0x188] sm:$0xff]  ;;  %v65_v61 = vld [vmem:[%s1936_s1 + $0x100] sm:$0xff]  ;;  %v112_v62 = vld [vmem:[%s1936_s1 + $0x278] sm:$0xff] }
  0x16   :  { %398 = vmatpush.msra.mxu1 %v55_v38  ;;  %379 = vmatpush.msra.mxu0 %v38_v40  ;;  %v144_v63 = vld [vmem:[%s1936_s1 + $0x378] sm:$0xff]  ;;  %v49_v0 = vld [vmem:[%s1936_s1 + $0x80] sm:$0xff]  ;;  %v111_v2 = vld [vmem:[%s1936_s1 + $0x270] sm:$0xff] }
  0x17   :  { %438 = vmatpush.msra.mxu3 %v87_v39  ;;  %419 = vmatpush.msra.mxu2 %v70_v41  ;;  %v81_v1 = vld [vmem:[%s1936_s1 + $0x180] sm:$0xff]  ;;  %v128_v3 = vld [vmem:[%s1936_s1 + $0x2f8] sm:$0xff]  ;;  %v143_v4 = vld [vmem:[%s1936_s1 + $0x370] sm:$0xff] }
  0x18   :  { %399 = vmatpush.msra.mxu1 %v54_v42  ;;  %380 = vmatpush.msra.mxu0 %v37_v44  ;;  %v160_v5 = vld [vmem:[%s1936_s1 + $0x3f8] sm:$0xff]  ;;  %v110_v6 = vld [vmem:[%s1936_s1 + $0x268] sm:$0xff]  ;;  %v127_v7 = vld [vmem:[%s1936_s1 + $0x2f0] sm:$0xff] }
  0x19   :  { %439 = vmatpush.msra.mxu3 %v86_v43  ;;  %420 = vmatpush.msra.mxu2 %v69_v45  ;;  %v142_v8 = vld [vmem:[%s1936_s1 + $0x368] sm:$0xff]  ;;  %v159_v9 = vld [vmem:[%s1936_s1 + $0x3f0] sm:$0xff]  ;;  %v109_v10 = vld [vmem:[%s1936_s1 + $0x260] sm:$0xff] }
  0x1a   :  { %400 = vmatpush.msra.mxu1 %v53_v46  ;;  %381 = vmatpush.msra.mxu0 %v36_v48  ;;  %v126_v11 = vld [vmem:[%s1936_s1 + $0x2e8] sm:$0xff]  ;;  %v141_v12 = vld [vmem:[%s1936_s1 + $0x360] sm:$0xff]  ;;  %v108_v14 = vld [vmem:[%s1936_s1 + $0x258] sm:$0xff] }
  0x1b   :  { %440 = vmatpush.msra.mxu3 %v85_v47  ;;  %421 = vmatpush.msra.mxu2 %v68_v49  ;;  %v158_v13 = vld [vmem:[%s1936_s1 + $0x3e8] sm:$0xff]  ;;  %v125_v15 = vld [vmem:[%s1936_s1 + $0x2e0] sm:$0xff]  ;;  %v140_v16 = vld [vmem:[%s1936_s1 + $0x358] sm:$0xff] }
  0x1c   :  { %401 = vmatpush.msra.mxu1 %v52_v50  ;;  %382 = vmatpush.msra.mxu0 %v35_v52  ;;  %v157_v17 = vld [vmem:[%s1936_s1 + $0x3e0] sm:$0xff]  ;;  %v107_v18 = vld [vmem:[%s1936_s1 + $0x250] sm:$0xff]  ;;  %v124_v19 = vld [vmem:[%s1936_s1 + $0x2d8] sm:$0xff] }
  0x1d   :  { %441 = vmatpush.msra.mxu3 %v84_v51  ;;  %422 = vmatpush.msra.mxu2 %v67_v53  ;;  %v139_v20 = vld [vmem:[%s1936_s1 + $0x350] sm:$0xff]  ;;  %v156_v21 = vld [vmem:[%s1936_s1 + $0x3d8] sm:$0xff]  ;;  %v106_v22 = vld [vmem:[%s1936_s1 + $0x248] sm:$0xff] }
  0x1e   :  { %402 = vmatpush.msra.mxu1 %v51_v54  ;;  %383 = vmatpush.msra.mxu0 %v34_v56  ;;  %v123_v23 = vld [vmem:[%s1936_s1 + $0x2d0] sm:$0xff]  ;;  %v138_v24 = vld [vmem:[%s1936_s1 + $0x348] sm:$0xff]  ;;  %v105_v26 = vld [vmem:[%s1936_s1 + $0x240] sm:$0xff] }
  0x1f   :  { %442 = vmatpush.msra.mxu3 %v83_v55  ;;  %423 = vmatpush.msra.mxu2 %v66_v57  ;;  %v155_v25 = vld [vmem:[%s1936_s1 + $0x3d0] sm:$0xff]  ;;  %v122_v27 = vld [vmem:[%s1936_s1 + $0x2c8] sm:$0xff]  ;;  %v137_v28 = vld [vmem:[%s1936_s1 + $0x340] sm:$0xff] }
  0x20   :  { %403 = vmatpush.msra.mxu1 %v50_v58  ;;  %384 = vmatpush.msra.mxu0 %v33_v60  ;;  %v154_v29 = vld [vmem:[%s1936_s1 + $0x3c8] sm:$0xff]  ;;  %v104_v30 = vld [vmem:[%s1936_s1 + $0x238] sm:$0xff]  ;;  %v121_v31 = vld [vmem:[%s1936_s1 + $0x2c0] sm:$0xff] }
  0x21   :  { %443 = vmatpush.msra.mxu3 %v82_v59  ;;  %424 = vmatpush.msra.mxu2 %v65_v61  ;;  %v136_v32 = vld [vmem:[%s1936_s1 + $0x338] sm:$0xff]  ;;  %v153_v33 = vld [vmem:[%s1936_s1 + $0x3c0] sm:$0xff]  ;;  %v103_v34 = vld [vmem:[%s1936_s1 + $0x230] sm:$0xff] }
  0x22   :  { %449 = vmatpush.msrb.mxu0 %v112_v62  ;;  %404 = vmatpush.msra.mxu1 %v49_v0  ;;  %v120_v35 = vld [vmem:[%s1936_s1 + $0x2b8] sm:$0xff]  ;;  %v135_v36 = vld [vmem:[%s1936_s1 + $0x330] sm:$0xff]  ;;  %v102_v38 = vld [vmem:[%s1936_s1 + $0x228] sm:$0xff] }
  0x23   :  { %489 = vmatpush.msrb.mxu2 %v144_v63  ;;  %444 = vmatpush.msra.mxu3 %v81_v1  ;;  %v152_v37 = vld [vmem:[%s1936_s1 + $0x3b8] sm:$0xff]  ;;  %v119_v39 = vld [vmem:[%s1936_s1 + $0x2b0] sm:$0xff]  ;;  %v134_v40 = vld [vmem:[%s1936_s1 + $0x328] sm:$0xff] }
  0x24   :  { %450 = vmatpush.msrb.mxu0 %v111_v2  ;;  %469 = vmatpush.msrb.mxu1 %v128_v3  ;;  %v151_v41 = vld [vmem:[%s1936_s1 + $0x3b0] sm:$0xff]  ;;  %v101_v42 = vld [vmem:[%s1936_s1 + $0x220] sm:$0xff]  ;;  %v118_v43 = vld [vmem:[%s1936_s1 + $0x2a8] sm:$0xff] }
  0x25   :  { %490 = vmatpush.msrb.mxu2 %v143_v4  ;;  %509 = vmatpush.msrb.mxu3 %v160_v5  ;;  %v133_v44 = vld [vmem:[%s1936_s1 + $0x320] sm:$0xff]  ;;  %v150_v45 = vld [vmem:[%s1936_s1 + $0x3a8] sm:$0xff]  ;;  %v100_v46 = vld [vmem:[%s1936_s1 + $0x218] sm:$0xff] }
  0x26   :  { %451 = vmatpush.msrb.mxu0 %v110_v6  ;;  %470 = vmatpush.msrb.mxu1 %v127_v7  ;;  %v117_v47 = vld [vmem:[%s1936_s1 + $0x2a0] sm:$0xff]  ;;  %v132_v48 = vld [vmem:[%s1936_s1 + $0x318] sm:$0xff]  ;;  %v99_v50 = vld [vmem:[%s1936_s1 + $0x210] sm:$0xff] }
  0x27   :  { %491 = vmatpush.msrb.mxu2 %v142_v8  ;;  %510 = vmatpush.msrb.mxu3 %v159_v9  ;;  %v149_v49 = vld [vmem:[%s1936_s1 + $0x3a0] sm:$0xff]  ;;  %v116_v51 = vld [vmem:[%s1936_s1 + $0x298] sm:$0xff]  ;;  %v131_v52 = vld [vmem:[%s1936_s1 + $0x310] sm:$0xff] }
  0x28   :  { %452 = vmatpush.msrb.mxu0 %v109_v10  ;;  %471 = vmatpush.msrb.mxu1 %v126_v11  ;;  %v148_v53 = vld [vmem:[%s1936_s1 + $0x398] sm:$0xff]  ;;  %v14_v54 = vld [vmem:[%s1935_s0 + $0x10] sm:$0xff]  ;;  %v98_v55 = vld [vmem:[%s1936_s1 + $0x208] sm:$0xff] }
  0x29   :  { %492 = vmatpush.msrb.mxu2 %v141_v12  ;;  %511 = vmatpush.msrb.mxu3 %v158_v13  ;;  %v115_v56 = vld [vmem:[%s1936_s1 + $0x290] sm:$0xff]  ;;  %v130_v57 = vld [vmem:[%s1936_s1 + $0x308] sm:$0xff]  ;;  %v12_v59 = vld [vmem:[%s1935_s0] sm:$0xff] }
  0x2a   :  { %453 = vmatpush.msrb.mxu0 %v108_v14  ;;  %472 = vmatpush.msrb.mxu1 %v125_v15  ;;  %v147_v58 = vld [vmem:[%s1936_s1 + $0x390] sm:$0xff]  ;;  %v15_v60 = vld [vmem:[%s1935_s0 + $0x18] sm:$0xff]  ;;  %v97_v61 = vld [vmem:[%s1936_s1 + $0x200] sm:$0xff] }
  0x2b   :  { %493 = vmatpush.msrb.mxu2 %v140_v16  ;;  %512 = vmatpush.msrb.mxu3 %v157_v17  ;;  %v114_v62 = vld [vmem:[%s1936_s1 + $0x288] sm:$0xff]  ;;  %v129_v63 = vld [vmem:[%s1936_s1 + $0x300] sm:$0xff]  ;;  %v176_v2 = vld [vmem:[%s1936_s1 + $0x478] sm:$0xff] }
  0x2c   :  { %454 = vmatpush.msrb.mxu0 %v107_v18  ;;  %473 = vmatpush.msrb.mxu1 %v124_v19  ;;  %v146_v0 = vld [vmem:[%s1936_s1 + $0x388] sm:$0xff]  ;;  %v208_v3 = vld [vmem:[%s1936_s1 + $0x578] sm:$0xff] }
  0x2d   :  { %494 = vmatpush.msrb.mxu2 %v139_v20  ;;  %513 = vmatpush.msrb.mxu3 %v156_v21  ;;  %v13_v1 = vld [vmem:[%s1935_s0 + $0x8] sm:$0xff] }
  0x2e   :  { %455 = vmatpush.msrb.mxu0 %v106_v22  ;;  %474 = vmatpush.msrb.mxu1 %v123_v23 }
  0x2f   :  { %495 = vmatpush.msrb.mxu2 %v138_v24  ;;  %514 = vmatpush.msrb.mxu3 %v155_v25 }
  0x30   :  { %456 = vmatpush.msrb.mxu0 %v105_v26  ;;  %475 = vmatpush.msrb.mxu1 %v122_v27 }
  0x31   :  { %496 = vmatpush.msrb.mxu2 %v137_v28  ;;  %515 = vmatpush.msrb.mxu3 %v154_v29 }
  0x32   :  { %457 = vmatpush.msrb.mxu0 %v104_v30  ;;  %476 = vmatpush.msrb.mxu1 %v121_v31 }
  0x33   :  { %497 = vmatpush.msrb.mxu2 %v136_v32  ;;  %516 = vmatpush.msrb.mxu3 %v153_v33 }
  0x34   :  { %458 = vmatpush.msrb.mxu0 %v103_v34  ;;  %477 = vmatpush.msrb.mxu1 %v120_v35 }
  0x35   :  { %498 = vmatpush.msrb.mxu2 %v135_v36  ;;  %517 = vmatpush.msrb.mxu3 %v152_v37 }
  0x36   :  { %459 = vmatpush.msrb.mxu0 %v102_v38  ;;  %478 = vmatpush.msrb.mxu1 %v119_v39 }
  0x37   :  { %499 = vmatpush.msrb.mxu2 %v134_v40  ;;  %518 = vmatpush.msrb.mxu3 %v151_v41 }
  0x38   :  { %460 = vmatpush.msrb.mxu0 %v101_v42  ;;  %479 = vmatpush.msrb.mxu1 %v118_v43 }
  0x39   :  { %500 = vmatpush.msrb.mxu2 %v133_v44  ;;  %519 = vmatpush.msrb.mxu3 %v150_v45 }
  0x3a   :  { %461 = vmatpush.msrb.mxu0 %v100_v46  ;;  %480 = vmatpush.msrb.mxu1 %v117_v47 }
  0x3b   :  { %501 = vmatpush.msrb.mxu2 %v132_v48  ;;  %520 = vmatpush.msrb.mxu3 %v149_v49 }
  0x3c   :  { %462 = vmatpush.msrb.mxu0 %v99_v50  ;;  %481 = vmatpush.msrb.mxu1 %v116_v51 }
  0x3d   :  { %502 = vmatpush.msrb.mxu2 %v131_v52  ;;  %521 = vmatpush.msrb.mxu3 %v148_v53 }
  0x3e   :  { %425 = vmatmul.f32.vlgmr.msra.gmra.mxu2 %v14_v54  ;;  %463 = vmatpush.msrb.mxu0 %v98_v55 }
  0x3f   :  { %482 = vmatpush.msrb.mxu1 %v115_v56  ;;  %503 = vmatpush.msrb.mxu2 %v130_v57 }
  0x40   :  { %522 = vmatpush.msrb.mxu3 %v147_v58  ;;  %385 = vmatmul.f32.vlgmr.msra.gmra.mxu0 %v12_v59 }
  0x41   :  { %445 = vmatmul.f32.vlgmr.msra.gmra.mxu3 %v15_v60  ;;  %464 = vmatpush.msrb.mxu0 %v97_v61 }
  0x42   :  { %7 = vsyncpa [#allocation3], 0  ;;  %483 = vmatpush.msrb.mxu1 %v114_v62  ;;  %504 = vmatpush.msrb.mxu2 %v129_v63  ;;  %v113_v4 = vld [vmem:[%s1936_s1 + $0x280] sm:$0xff]  ;;  %v175_v6 = vld [vmem:[%s1936_s1 + $0x470] sm:$0xff]  ;;  %s807_s25 = sshll.u32 %s1937_s2, 4  ;;  %vm798_vm0 = vcmask 31744   ;;  %s808_s25 = int_to_ptr.hbm [resolvable:$true] %s807_s25 }
  0x43   :  { %v145_v5 = vld [vmem:[%s1936_s1 + $0x380] sm:$0xff]  ;;  %523 = vmatpush.msrb.mxu3 %v146_v0  ;;  %405 = vmatmul.f32.vlgmr.msra.gmra.mxu1 %v13_v1  ;;  %v192_v7 = vld [vmem:[%s1936_s1 + $0x4f8] sm:$0xff]  ;;  %v207_v8 = vld [vmem:[%s1936_s1 + $0x570] sm:$0xff] }
  0x44   :  { %529 = vmatpush.msra.mxu0 %v176_v2  ;;  %569 = vmatpush.msra.mxu2 %v208_v3  ;;  %v224_v9 = vld [vmem:[%s1936_s1 + $0x5f8] sm:$0xff]  ;;  %v18_v10 = vld [vmem:[%s1935_s0 + $0x30] sm:$0xff]  ;;  %v174_v11 = vld [vmem:[%s1936_s1 + $0x468] sm:$0xff] }
  0x45   :  { %484 = vmatpush.msrb.mxu1 %v113_v4  ;;  %524 = vmatpush.msrb.mxu3 %v145_v5  ;;  %v191_v12 = vld [vmem:[%s1936_s1 + $0x4f0] sm:$0xff]  ;;  %v206_v13 = vld [vmem:[%s1936_s1 + $0x568] sm:$0xff]  ;;  %v16_v15 = vld [vmem:[%s1935_s0 + $0x20] sm:$0xff] }
  0x46   :  { %530 = vmatpush.msra.mxu0 %v175_v6  ;;  %570 = vmatpush.msra.mxu2 %v207_v8  ;;  %v223_v14 = vld [vmem:[%s1936_s1 + $0x5f0] sm:$0xff]  ;;  %v19_v16 = vld [vmem:[%s1935_s0 + $0x38] sm:$0xff]  ;;  %v173_v17 = vld [vmem:[%s1936_s1 + $0x460] sm:$0xff] }
  0x47   :  { %549 = vmatpush.msra.mxu1 %v192_v7  ;;  %589 = vmatpush.msra.mxu3 %v224_v9  ;;  %v190_v18 = vld [vmem:[%s1936_s1 + $0x4e8] sm:$0xff]  ;;  %v205_v19 = vld [vmem:[%s1936_s1 + $0x560] sm:$0xff]  ;;  %v172_v22 = vld [vmem:[%s1936_s1 + $0x458] sm:$0xff] }
  0x48   :  { %505 = vmatmul.f32.vlgmr.msrb.gmra.mxu2 %v18_v10  ;;  %531 = vmatpush.msra.mxu0 %v174_v11  ;;  %v222_v20 = vld [vmem:[%s1936_s1 + $0x5e8] sm:$0xff]  ;;  %v189_v23 = vld [vmem:[%s1936_s1 + $0x4e0] sm:$0xff]  ;;  %v204_v24 = vld [vmem:[%s1936_s1 + $0x558] sm:$0xff] }
  0x49   :  { %550 = vmatpush.msra.mxu1 %v191_v12  ;;  %571 = vmatpush.msra.mxu2 %v206_v13  ;;  %v17_v21 = vld [vmem:[%s1935_s0 + $0x28] sm:$0xff]  ;;  %v221_v25 = vld [vmem:[%s1936_s1 + $0x5e0] sm:$0xff]  ;;  %v171_v26 = vld [vmem:[%s1936_s1 + $0x450] sm:$0xff] }
  0x4a   :  { %590 = vmatpush.msra.mxu3 %v223_v14  ;;  %465 = vmatmul.f32.vlgmr.msrb.gmra.mxu0 %v16_v15  ;;  %v188_v27 = vld [vmem:[%s1936_s1 + $0x4d8] sm:$0xff]  ;;  %v203_v28 = vld [vmem:[%s1936_s1 + $0x550] sm:$0xff]  ;;  %v170_v30 = vld [vmem:[%s1936_s1 + $0x448] sm:$0xff] }
  0x4b   :  { %525 = vmatmul.f32.vlgmr.msrb.gmra.mxu3 %v19_v16  ;;  %532 = vmatpush.msra.mxu0 %v173_v17  ;;  %v220_v29 = vld [vmem:[%s1936_s1 + $0x5d8] sm:$0xff]  ;;  %v187_v31 = vld [vmem:[%s1936_s1 + $0x4d0] sm:$0xff]  ;;  %v202_v32 = vld [vmem:[%s1936_s1 + $0x548] sm:$0xff] }
  0x4c   :  { %551 = vmatpush.msra.mxu1 %v190_v18  ;;  %572 = vmatpush.msra.mxu2 %v205_v19  ;;  %v219_v33 = vld [vmem:[%s1936_s1 + $0x5d0] sm:$0xff]  ;;  %v169_v34 = vld [vmem:[%s1936_s1 + $0x440] sm:$0xff]  ;;  %v186_v35 = vld [vmem:[%s1936_s1 + $0x4c8] sm:$0xff] }
  0x4d   :  { %591 = vmatpush.msra.mxu3 %v222_v20  ;;  %485 = vmatmul.f32.vlgmr.msrb.gmra.mxu1 %v17_v21  ;;  %v201_v36 = vld [vmem:[%s1936_s1 + $0x540] sm:$0xff]  ;;  %v218_v37 = vld [vmem:[%s1936_s1 + $0x5c8] sm:$0xff]  ;;  %v168_v38 = vld [vmem:[%s1936_s1 + $0x438] sm:$0xff] }
  0x4e   :  { %533 = vmatpush.msra.mxu0 %v172_v22  ;;  %552 = vmatpush.msra.mxu1 %v189_v23  ;;  %v185_v39 = vld [vmem:[%s1936_s1 + $0x4c0] sm:$0xff]  ;;  %v200_v40 = vld [vmem:[%s1936_s1 + $0x538] sm:$0xff]  ;;  %v167_v42 = vld [vmem:[%s1936_s1 + $0x430] sm:$0xff] }
  0x4f   :  { %573 = vmatpush.msra.mxu2 %v204_v24  ;;  %592 = vmatpush.msra.mxu3 %v221_v25  ;;  %v217_v41 = vld [vmem:[%s1936_s1 + $0x5c0] sm:$0xff]  ;;  %v184_v43 = vld [vmem:[%s1936_s1 + $0x4b8] sm:$0xff]  ;;  %v199_v44 = vld [vmem:[%s1936_s1 + $0x530] sm:$0xff] }
  0x50   :  { %534 = vmatpush.msra.mxu0 %v171_v26  ;;  %553 = vmatpush.msra.mxu1 %v188_v27  ;;  %v216_v45 = vld [vmem:[%s1936_s1 + $0x5b8] sm:$0xff]  ;;  %v166_v46 = vld [vmem:[%s1936_s1 + $0x428] sm:$0xff]  ;;  %v183_v47 = vld [vmem:[%s1936_s1 + $0x4b0] sm:$0xff] }
  0x51   :  { %574 = vmatpush.msra.mxu2 %v203_v28  ;;  %593 = vmatpush.msra.mxu3 %v220_v29  ;;  %v198_v48 = vld [vmem:[%s1936_s1 + $0x528] sm:$0xff]  ;;  %v215_v49 = vld [vmem:[%s1936_s1 + $0x5b0] sm:$0xff]  ;;  %v165_v50 = vld [vmem:[%s1936_s1 + $0x420] sm:$0xff] }
  0x52   :  { %535 = vmatpush.msra.mxu0 %v170_v30  ;;  %554 = vmatpush.msra.mxu1 %v187_v31  ;;  %v182_v51 = vld [vmem:[%s1936_s1 + $0x4a8] sm:$0xff]  ;;  %v197_v52 = vld [vmem:[%s1936_s1 + $0x520] sm:$0xff]  ;;  %v164_v54 = vld [vmem:[%s1936_s1 + $0x418] sm:$0xff] }
  0x53   :  { %575 = vmatpush.msra.mxu2 %v202_v32  ;;  %594 = vmatpush.msra.mxu3 %v219_v33  ;;  %v214_v53 = vld [vmem:[%s1936_s1 + $0x5a8] sm:$0xff]  ;;  %v181_v55 = vld [vmem:[%s1936_s1 + $0x4a0] sm:$0xff]  ;;  %v196_v56 = vld [vmem:[%s1936_s1 + $0x518] sm:$0xff] }
  0x54   :  { %536 = vmatpush.msra.mxu0 %v169_v34  ;;  %555 = vmatpush.msra.mxu1 %v186_v35  ;;  %v213_v57 = vld [vmem:[%s1936_s1 + $0x5a0] sm:$0xff]  ;;  %v163_v58 = vld [vmem:[%s1936_s1 + $0x410] sm:$0xff]  ;;  %v180_v59 = vld [vmem:[%s1936_s1 + $0x498] sm:$0xff] }
  0x55   :  { %576 = vmatpush.msra.mxu2 %v201_v36  ;;  %595 = vmatpush.msra.mxu3 %v218_v37  ;;  %v195_v60 = vld [vmem:[%s1936_s1 + $0x510] sm:$0xff]  ;;  %v212_v61 = vld [vmem:[%s1936_s1 + $0x598] sm:$0xff]  ;;  %v162_v62 = vld [vmem:[%s1936_s1 + $0x408] sm:$0xff] }
  0x56   :  { %537 = vmatpush.msra.mxu0 %v168_v38  ;;  %556 = vmatpush.msra.mxu1 %v185_v39  ;;  %v179_v63 = vld [vmem:[%s1936_s1 + $0x490] sm:$0xff]  ;;  %v194_v0 = vld [vmem:[%s1936_s1 + $0x508] sm:$0xff]  ;;  %v161_v2 = vld [vmem:[%s1936_s1 + $0x400] sm:$0xff] }
  0x57   :  { %577 = vmatpush.msra.mxu2 %v200_v40  ;;  %596 = vmatpush.msra.mxu3 %v217_v41  ;;  %v211_v1 = vld [vmem:[%s1936_s1 + $0x590] sm:$0xff]  ;;  %v178_v3 = vld [vmem:[%s1936_s1 + $0x488] sm:$0xff]  ;;  %v193_v4 = vld [vmem:[%s1936_s1 + $0x500] sm:$0xff] }
  0x58   :  { %538 = vmatpush.msra.mxu0 %v167_v42  ;;  %557 = vmatpush.msra.mxu1 %v184_v43  ;;  %v210_v5 = vld [vmem:[%s1936_s1 + $0x588] sm:$0xff]  ;;  %v20_v6 = vld [vmem:[%s1935_s0 + $0x40] sm:$0xff]  ;;  %v22_v7 = vld [vmem:[%s1935_s0 + $0x50] sm:$0xff] }
  0x59   :  { %578 = vmatpush.msra.mxu2 %v199_v44  ;;  %597 = vmatpush.msra.mxu3 %v216_v45  ;;  %v240_v8 = vld [vmem:[%s1936_s1 + $0x678] sm:$0xff]  ;;  %v177_v10 = vld [vmem:[%s1936_s1 + $0x480] sm:$0xff]  ;;  %v21_v12 = vld [vmem:[%s1935_s0 + $0x48] sm:$0xff] }
  0x5a   :  { %539 = vmatpush.msra.mxu0 %v166_v46  ;;  %558 = vmatpush.msra.mxu1 %v183_v47  ;;  %v272_v9 = vld [vmem:[%s1936_s1 + $0x778] sm:$0xff]  ;;  %v209_v11 = vld [vmem:[%s1936_s1 + $0x580] sm:$0xff]  ;;  %v239_v14 = vld [vmem:[%s1936_s1 + $0x670] sm:$0xff] }
  0x5b   :  { %579 = vmatpush.msra.mxu2 %v198_v48  ;;  %598 = vmatpush.msra.mxu3 %v215_v49  ;;  %v23_v13 = vld [vmem:[%s1935_s0 + $0x58] sm:$0xff]  ;;  %v271_v16 = vld [vmem:[%s1936_s1 + $0x770] sm:$0xff]  ;;  %v238_v18 = vld [vmem:[%s1936_s1 + $0x668] sm:$0xff] }
  0x5c   :  { %540 = vmatpush.msra.mxu0 %v165_v50  ;;  %559 = vmatpush.msra.mxu1 %v182_v51  ;;  %v256_v15 = vld [vmem:[%s1936_s1 + $0x6f8] sm:$0xff]  ;;  %v255_v19 = vld [vmem:[%s1936_s1 + $0x6f0] sm:$0xff]  ;;  %v270_v20 = vld [vmem:[%s1936_s1 + $0x768] sm:$0xff] }
  0x5d   :  { %580 = vmatpush.msra.mxu2 %v197_v52  ;;  %599 = vmatpush.msra.mxu3 %v214_v53  ;;  %v288_v17 = vld [vmem:[%s1936_s1 + $0x7f8] sm:$0xff]  ;;  %v287_v21 = vld [vmem:[%s1936_s1 + $0x7f0] sm:$0xff]  ;;  %v237_v22 = vld [vmem:[%s1936_s1 + $0x660] sm:$0xff] }
  0x5e   :  { %541 = vmatpush.msra.mxu0 %v164_v54  ;;  %560 = vmatpush.msra.mxu1 %v181_v55  ;;  %v254_v23 = vld [vmem:[%s1936_s1 + $0x6e8] sm:$0xff]  ;;  %v269_v24 = vld [vmem:[%s1936_s1 + $0x760] sm:$0xff]  ;;  %v236_v26 = vld [vmem:[%s1936_s1 + $0x658] sm:$0xff] }
  0x5f   :  { %581 = vmatpush.msra.mxu2 %v196_v56  ;;  %600 = vmatpush.msra.mxu3 %v213_v57  ;;  %v286_v25 = vld [vmem:[%s1936_s1 + $0x7e8] sm:$0xff]  ;;  %v253_v27 = vld [vmem:[%s1936_s1 + $0x6e0] sm:$0xff]  ;;  %v268_v28 = vld [vmem:[%s1936_s1 + $0x758] sm:$0xff] }
  0x60   :  { %542 = vmatpush.msra.mxu0 %v163_v58  ;;  %561 = vmatpush.msra.mxu1 %v180_v59  ;;  %v285_v29 = vld [vmem:[%s1936_s1 + $0x7e0] sm:$0xff]  ;;  %v235_v30 = vld [vmem:[%s1936_s1 + $0x650] sm:$0xff]  ;;  %v252_v31 = vld [vmem:[%s1936_s1 + $0x6d8] sm:$0xff] }
  0x61   :  { %582 = vmatpush.msra.mxu2 %v195_v60  ;;  %601 = vmatpush.msra.mxu3 %v212_v61  ;;  %v267_v32 = vld [vmem:[%s1936_s1 + $0x750] sm:$0xff]  ;;  %v284_v33 = vld [vmem:[%s1936_s1 + $0x7d8] sm:$0xff]  ;;  %v234_v34 = vld [vmem:[%s1936_s1 + $0x648] sm:$0xff] }
  0x62   :  { %543 = vmatpush.msra.mxu0 %v162_v62  ;;  %562 = vmatpush.msra.mxu1 %v179_v63  ;;  %v251_v35 = vld [vmem:[%s1936_s1 + $0x6d0] sm:$0xff]  ;;  %v266_v36 = vld [vmem:[%s1936_s1 + $0x748] sm:$0xff]  ;;  %v233_v38 = vld [vmem:[%s1936_s1 + $0x640] sm:$0xff] }
  0x63   :  { %583 = vmatpush.msra.mxu2 %v194_v0  ;;  %602 = vmatpush.msra.mxu3 %v211_v1  ;;  %v283_v37 = vld [vmem:[%s1936_s1 + $0x7d0] sm:$0xff]  ;;  %v250_v39 = vld [vmem:[%s1936_s1 + $0x6c8] sm:$0xff]  ;;  %v265_v40 = vld [vmem:[%s1936_s1 + $0x740] sm:$0xff] }
  0x64   :  { %544 = vmatpush.msra.mxu0 %v161_v2  ;;  %563 = vmatpush.msra.mxu1 %v178_v3  ;;  %v282_v41 = vld [vmem:[%s1936_s1 + $0x7c8] sm:$0xff]  ;;  %v232_v42 = vld [vmem:[%s1936_s1 + $0x638] sm:$0xff]  ;;  %v249_v43 = vld [vmem:[%s1936_s1 + $0x6c0] sm:$0xff] }
  0x65   :  { %584 = vmatpush.msra.mxu2 %v193_v4  ;;  %603 = vmatpush.msra.mxu3 %v210_v5  ;;  %v264_v44 = vld [vmem:[%s1936_s1 + $0x738] sm:$0xff]  ;;  %v281_v45 = vld [vmem:[%s1936_s1 + $0x7c0] sm:$0xff]  ;;  %v231_v46 = vld [vmem:[%s1936_s1 + $0x630] sm:$0xff] }
  0x66   :  { %545 = vmatmul.f32.vlgmr.msra.gmra.mxu0 %v20_v6  ;;  %585 = vmatmul.f32.vlgmr.msra.gmra.mxu2 %v22_v7  ;;  %v248_v47 = vld [vmem:[%s1936_s1 + $0x6b8] sm:$0xff]  ;;  %v263_v48 = vld [vmem:[%s1936_s1 + $0x730] sm:$0xff]  ;;  %v230_v50 = vld [vmem:[%s1936_s1 + $0x628] sm:$0xff] }
  0x67   :  { %609 = vmatpush.msrb.mxu0 %v240_v8  ;;  %649 = vmatpush.msrb.mxu2 %v272_v9  ;;  %v280_v49 = vld [vmem:[%s1936_s1 + $0x7b8] sm:$0xff]  ;;  %v247_v51 = vld [vmem:[%s1936_s1 + $0x6b0] sm:$0xff]  ;;  %v262_v52 = vld [vmem:[%s1936_s1 + $0x728] sm:$0xff] }
  0x68   :  { %564 = vmatpush.msra.mxu1 %v177_v10  ;;  %604 = vmatpush.msra.mxu3 %v209_v11  ;;  %v279_v53 = vld [vmem:[%s1936_s1 + $0x7b0] sm:$0xff]  ;;  %v229_v54 = vld [vmem:[%s1936_s1 + $0x620] sm:$0xff]  ;;  %v246_v55 = vld [vmem:[%s1936_s1 + $0x6a8] sm:$0xff] }
  0x69   :  { %565 = vmatmul.f32.vlgmr.msra.gmra.mxu1 %v21_v12  ;;  %605 = vmatmul.f32.vlgmr.msra.gmra.mxu3 %v23_v13  ;;  %v261_v56 = vld [vmem:[%s1936_s1 + $0x720] sm:$0xff]  ;;  %v278_v57 = vld [vmem:[%s1936_s1 + $0x7a8] sm:$0xff]  ;;  %v228_v58 = vld [vmem:[%s1936_s1 + $0x618] sm:$0xff] }
  0x6a   :  { %610 = vmatpush.msrb.mxu0 %v239_v14  ;;  %629 = vmatpush.msrb.mxu1 %v256_v15  ;;  %v245_v59 = vld [vmem:[%s1936_s1 + $0x6a0] sm:$0xff]  ;;  %v260_v60 = vld [vmem:[%s1936_s1 + $0x718] sm:$0xff]  ;;  %v227_v62 = vld [vmem:[%s1936_s1 + $0x610] sm:$0xff] }
  0x6b   :  { %650 = vmatpush.msrb.mxu2 %v271_v16  ;;  %669 = vmatpush.msrb.mxu3 %v288_v17  ;;  %v277_v61 = vld [vmem:[%s1936_s1 + $0x7a0] sm:$0xff]  ;;  %v244_v63 = vld [vmem:[%s1936_s1 + $0x698] sm:$0xff]  ;;  %v259_v0 = vld [vmem:[%s1936_s1 + $0x710] sm:$0xff] }
  0x6c   :  { %611 = vmatpush.msrb.mxu0 %v238_v18  ;;  %630 = vmatpush.msrb.mxu1 %v255_v19  ;;  %v276_v1 = vld [vmem:[%s1936_s1 + $0x798] sm:$0xff]  ;;  %v226_v2 = vld [vmem:[%s1936_s1 + $0x608] sm:$0xff]  ;;  %v243_v3 = vld [vmem:[%s1936_s1 + $0x690] sm:$0xff] }
  0x6d   :  { %651 = vmatpush.msrb.mxu2 %v270_v20  ;;  %670 = vmatpush.msrb.mxu3 %v287_v21  ;;  %v258_v4 = vld [vmem:[%s1936_s1 + $0x708] sm:$0xff]  ;;  %v275_v5 = vld [vmem:[%s1936_s1 + $0x790] sm:$0xff]  ;;  %v225_v6 = vld [vmem:[%s1936_s1 + $0x600] sm:$0xff] }
  0x6e   :  { %612 = vmatpush.msrb.mxu0 %v237_v22  ;;  %631 = vmatpush.msrb.mxu1 %v254_v23  ;;  %v242_v7 = vld [vmem:[%s1936_s1 + $0x688] sm:$0xff]  ;;  %v257_v8 = vld [vmem:[%s1936_s1 + $0x700] sm:$0xff]  ;;  %v26_v11 = vld [vmem:[%s1935_s0 + $0x70] sm:$0xff] }
  0x6f   :  { %652 = vmatpush.msrb.mxu2 %v269_v24  ;;  %671 = vmatpush.msrb.mxu3 %v286_v25  ;;  %v274_v9 = vld [vmem:[%s1936_s1 + $0x788] sm:$0xff]  ;;  %v24_v10 = vld [vmem:[%s1935_s0 + $0x60] sm:$0xff]  ;;  %v304_v12 = vld [vmem:[%s1936_s1 + $0x878] sm:$0xff] }
  0x70   :  { %613 = vmatpush.msrb.mxu0 %v236_v26  ;;  %632 = vmatpush.msrb.mxu1 %v253_v27  ;;  %v336_v13 = vld [vmem:[%s1936_s1 + $0x978] sm:$0xff]  ;;  %v241_v14 = vld [vmem:[%s1936_s1 + $0x680] sm:$0xff]  ;;  %v25_v16 = vld [vmem:[%s1935_s0 + $0x68] sm:$0xff] }
  0x71   :  { %653 = vmatpush.msrb.mxu2 %v268_v28  ;;  %672 = vmatpush.msrb.mxu3 %v285_v29  ;;  %v273_v15 = vld [vmem:[%s1936_s1 + $0x780] sm:$0xff]  ;;  %v27_v17 = vld [vmem:[%s1935_s0 + $0x78] sm:$0xff]  ;;  %v303_v18 = vld [vmem:[%s1936_s1 + $0x870] sm:$0xff] }
  0x72   :  { %614 = vmatpush.msrb.mxu0 %v235_v30  ;;  %633 = vmatpush.msrb.mxu1 %v252_v31  ;;  %v320_v19 = vld [vmem:[%s1936_s1 + $0x8f8] sm:$0xff]  ;;  %v335_v20 = vld [vmem:[%s1936_s1 + $0x970] sm:$0xff]  ;;  %v302_v22 = vld [vmem:[%s1936_s1 + $0x868] sm:$0xff] }
  0x73   :  { %654 = vmatpush.msrb.mxu2 %v267_v32  ;;  %673 = vmatpush.msrb.mxu3 %v284_v33  ;;  %v352_v21 = vld [vmem:[%s1936_s1 + $0x9f8] sm:$0xff]  ;;  %v319_v23 = vld [vmem:[%s1936_s1 + $0x8f0] sm:$0xff]  ;;  %v334_v24 = vld [vmem:[%s1936_s1 + $0x968] sm:$0xff] }
  0x74   :  { %615 = vmatpush.msrb.mxu0 %v234_v34  ;;  %634 = vmatpush.msrb.mxu1 %v251_v35  ;;  %v351_v25 = vld [vmem:[%s1936_s1 + $0x9f0] sm:$0xff]  ;;  %v301_v26 = vld [vmem:[%s1936_s1 + $0x860] sm:$0xff]  ;;  %v318_v27 = vld [vmem:[%s1936_s1 + $0x8e8] sm:$0xff] }
  0x75   :  { %655 = vmatpush.msrb.mxu2 %v266_v36  ;;  %674 = vmatpush.msrb.mxu3 %v283_v37  ;;  %v333_v28 = vld [vmem:[%s1936_s1 + $0x960] sm:$0xff]  ;;  %v350_v29 = vld [vmem:[%s1936_s1 + $0x9e8] sm:$0xff]  ;;  %v300_v30 = vld [vmem:[%s1936_s1 + $0x858] sm:$0xff] }
  0x76   :  { %616 = vmatpush.msrb.mxu0 %v233_v38  ;;  %635 = vmatpush.msrb.mxu1 %v250_v39  ;;  %v317_v31 = vld [vmem:[%s1936_s1 + $0x8e0] sm:$0xff]  ;;  %v332_v32 = vld [vmem:[%s1936_s1 + $0x958] sm:$0xff]  ;;  %v299_v34 = vld [vmem:[%s1936_s1 + $0x850] sm:$0xff] }
  0x77   :  { %656 = vmatpush.msrb.mxu2 %v265_v40  ;;  %675 = vmatpush.msrb.mxu3 %v282_v41  ;;  %v349_v33 = vld [vmem:[%s1936_s1 + $0x9e0] sm:$0xff]  ;;  %v316_v35 = vld [vmem:[%s1936_s1 + $0x8d8] sm:$0xff]  ;;  %v331_v36 = vld [vmem:[%s1936_s1 + $0x950] sm:$0xff] }
  0x78   :  { %617 = vmatpush.msrb.mxu0 %v232_v42  ;;  %636 = vmatpush.msrb.mxu1 %v249_v43  ;;  %v348_v37 = vld [vmem:[%s1936_s1 + $0x9d8] sm:$0xff]  ;;  %v298_v38 = vld [vmem:[%s1936_s1 + $0x848] sm:$0xff]  ;;  %v315_v39 = vld [vmem:[%s1936_s1 + $0x8d0] sm:$0xff] }
  0x79   :  { %657 = vmatpush.msrb.mxu2 %v264_v44  ;;  %676 = vmatpush.msrb.mxu3 %v281_v45  ;;  %v330_v40 = vld [vmem:[%s1936_s1 + $0x948] sm:$0xff]  ;;  %v347_v41 = vld [vmem:[%s1936_s1 + $0x9d0] sm:$0xff]  ;;  %v297_v42 = vld [vmem:[%s1936_s1 + $0x840] sm:$0xff] }
  0x7a   :  { %618 = vmatpush.msrb.mxu0 %v231_v46  ;;  %637 = vmatpush.msrb.mxu1 %v248_v47  ;;  %v314_v43 = vld [vmem:[%s1936_s1 + $0x8c8] sm:$0xff]  ;;  %v329_v44 = vld [vmem:[%s1936_s1 + $0x940] sm:$0xff]  ;;  %v296_v46 = vld [vmem:[%s1936_s1 + $0x838] sm:$0xff] }
  0x7b   :  { %658 = vmatpush.msrb.mxu2 %v263_v48  ;;  %677 = vmatpush.msrb.mxu3 %v280_v49  ;;  %v346_v45 = vld [vmem:[%s1936_s1 + $0x9c8] sm:$0xff]  ;;  %v313_v47 = vld [vmem:[%s1936_s1 + $0x8c0] sm:$0xff]  ;;  %v328_v48 = vld [vmem:[%s1936_s1 + $0x938] sm:$0xff] }
  0x7c   :  { %619 = vmatpush.msrb.mxu0 %v230_v50  ;;  %638 = vmatpush.msrb.mxu1 %v247_v51  ;;  %v345_v49 = vld [vmem:[%s1936_s1 + $0x9c0] sm:$0xff]  ;;  %v295_v50 = vld [vmem:[%s1936_s1 + $0x830] sm:$0xff]  ;;  %v312_v51 = vld [vmem:[%s1936_s1 + $0x8b8] sm:$0xff] }
  0x7d   :  { %659 = vmatpush.msrb.mxu2 %v262_v52  ;;  %678 = vmatpush.msrb.mxu3 %v279_v53  ;;  %v327_v52 = vld [vmem:[%s1936_s1 + $0x930] sm:$0xff]  ;;  %v344_v53 = vld [vmem:[%s1936_s1 + $0x9b8] sm:$0xff] }
  0x7e   :  { %620 = vmatpush.msrb.mxu0 %v229_v54  ;;  %639 = vmatpush.msrb.mxu1 %v246_v55  ;;  %v294_v54 = vld [vmem:[%s1936_s1 + $0x828] sm:$0xff]  ;;  %v311_v55 = vld [vmem:[%s1936_s1 + $0x8b0] sm:$0xff] }
  0x7f   :  { %660 = vmatpush.msrb.mxu2 %v261_v56  ;;  %679 = vmatpush.msrb.mxu3 %v278_v57  ;;  %v326_v56 = vld [vmem:[%s1936_s1 + $0x928] sm:$0xff]  ;;  %v343_v57 = vld [vmem:[%s1936_s1 + $0x9b0] sm:$0xff] }
  0x80   :  { %621 = vmatpush.msrb.mxu0 %v228_v58  ;;  %640 = vmatpush.msrb.mxu1 %v245_v59  ;;  %v293_v58 = vld [vmem:[%s1936_s1 + $0x820] sm:$0xff]  ;;  %v310_v59 = vld [vmem:[%s1936_s1 + $0x8a8] sm:$0xff] }
  0x81   :  { %661 = vmatpush.msrb.mxu2 %v260_v60  ;;  %680 = vmatpush.msrb.mxu3 %v277_v61  ;;  %v325_v60 = vld [vmem:[%s1936_s1 + $0x920] sm:$0xff]  ;;  %v342_v61 = vld [vmem:[%s1936_s1 + $0x9a8] sm:$0xff] }
  0x82   :  { %622 = vmatpush.msrb.mxu0 %v227_v62  ;;  %641 = vmatpush.msrb.mxu1 %v244_v63  ;;  %v292_v62 = vld [vmem:[%s1936_s1 + $0x818] sm:$0xff]  ;;  %v309_v63 = vld [vmem:[%s1936_s1 + $0x8a0] sm:$0xff] }
  0x83   :  { %662 = vmatpush.msrb.mxu2 %v259_v0  ;;  %681 = vmatpush.msrb.mxu3 %v276_v1  ;;  %v324_v0 = vld [vmem:[%s1936_s1 + $0x918] sm:$0xff]  ;;  %v341_v1 = vld [vmem:[%s1936_s1 + $0x9a0] sm:$0xff] }
  0x84   :  { %623 = vmatpush.msrb.mxu0 %v226_v2  ;;  %642 = vmatpush.msrb.mxu1 %v243_v3  ;;  %v291_v2 = vld [vmem:[%s1936_s1 + $0x810] sm:$0xff]  ;;  %v308_v3 = vld [vmem:[%s1936_s1 + $0x898] sm:$0xff] }
  0x85   :  { %663 = vmatpush.msrb.mxu2 %v258_v4  ;;  %682 = vmatpush.msrb.mxu3 %v275_v5  ;;  %v323_v4 = vld [vmem:[%s1936_s1 + $0x910] sm:$0xff]  ;;  %v340_v5 = vld [vmem:[%s1936_s1 + $0x998] sm:$0xff] }
  0x86   :  { %624 = vmatpush.msrb.mxu0 %v225_v6  ;;  %643 = vmatpush.msrb.mxu1 %v242_v7  ;;  %v290_v6 = vld [vmem:[%s1936_s1 + $0x808] sm:$0xff]  ;;  %v307_v7 = vld [vmem:[%s1936_s1 + $0x890] sm:$0xff] }
  0x87   :  { %664 = vmatpush.msrb.mxu2 %v257_v8  ;;  %683 = vmatpush.msrb.mxu3 %v274_v9  ;;  %v322_v8 = vld [vmem:[%s1936_s1 + $0x908] sm:$0xff]  ;;  %v339_v9 = vld [vmem:[%s1936_s1 + $0x990] sm:$0xff] }
  0x88   :  { %625 = vmatmul.f32.vlgmr.msrb.gmra.mxu0 %v24_v10  ;;  %665 = vmatmul.f32.vlgmr.msrb.gmra.mxu2 %v26_v11  ;;  %v289_v10 = vld [vmem:[%s1936_s1 + $0x800] sm:$0xff]  ;;  %v306_v11 = vld [vmem:[%s1936_s1 + $0x888] sm:$0xff] }
  0x89   :  { %689 = vmatpush.msra.mxu0 %v304_v12  ;;  %729 = vmatpush.msra.mxu2 %v336_v13  ;;  %v321_v12 = vld [vmem:[%s1936_s1 + $0x900] sm:$0xff]  ;;  %v338_v13 = vld [vmem:[%s1936_s1 + $0x988] sm:$0xff] }
  0x8a   :  { %644 = vmatpush.msrb.mxu1 %v241_v14  ;;  %684 = vmatpush.msrb.mxu3 %v273_v15  ;;  %v28_v14 = vld [vmem:[%s1935_s0 + $0x80] sm:$0xff]  ;;  %v30_v15 = vld [vmem:[%s1935_s0 + $0x90] sm:$0xff] }
  0x8b   :  { %645 = vmatmul.f32.vlgmr.msrb.gmra.mxu1 %v25_v16  ;;  %685 = vmatmul.f32.vlgmr.msrb.gmra.mxu3 %v27_v17  ;;  %v368_v16 = vld [vmem:[%s1936_s1 + $0xa78] sm:$0xff]  ;;  %v305_v17 = vld [vmem:[%s1936_s1 + $0x880] sm:$0xff] }
  0x8c   :  { %690 = vmatpush.msra.mxu0 %v303_v18  ;;  %709 = vmatpush.msra.mxu1 %v320_v19  ;;  %v337_v18 = vld [vmem:[%s1936_s1 + $0x980] sm:$0xff]  ;;  %v29_v19 = vld [vmem:[%s1935_s0 + $0x88] sm:$0xff] }
  0x8d   :  { %730 = vmatpush.msra.mxu2 %v335_v20  ;;  %749 = vmatpush.msra.mxu3 %v352_v21  ;;  %v31_v20 = vld [vmem:[%s1935_s0 + $0x98] sm:$0xff]  ;;  %v367_v21 = vld [vmem:[%s1936_s1 + $0xa70] sm:$0xff] }
  0x8e   :  { %691 = vmatpush.msra.mxu0 %v302_v22  ;;  %710 = vmatpush.msra.mxu1 %v319_v23  ;;  %v366_v22 = vld [vmem:[%s1936_s1 + $0xa68] sm:$0xff]  ;;  %v365_v23 = vld [vmem:[%s1936_s1 + $0xa60] sm:$0xff] }
  0x8f   :  { %731 = vmatpush.msra.mxu2 %v334_v24  ;;  %750 = vmatpush.msra.mxu3 %v351_v25  ;;  %v364_v24 = vld [vmem:[%s1936_s1 + $0xa58] sm:$0xff]  ;;  %v363_v25 = vld [vmem:[%s1936_s1 + $0xa50] sm:$0xff] }
  0x90   :  { %692 = vmatpush.msra.mxu0 %v301_v26  ;;  %711 = vmatpush.msra.mxu1 %v318_v27  ;;  %v362_v26 = vld [vmem:[%s1936_s1 + $0xa48] sm:$0xff]  ;;  %v361_v27 = vld [vmem:[%s1936_s1 + $0xa40] sm:$0xff] }
  0x91   :  { %732 = vmatpush.msra.mxu2 %v333_v28  ;;  %751 = vmatpush.msra.mxu3 %v350_v29  ;;  %v360_v28 = vld [vmem:[%s1936_s1 + $0xa38] sm:$0xff]  ;;  %v359_v29 = vld [vmem:[%s1936_s1 + $0xa30] sm:$0xff] }
  0x92   :  { %693 = vmatpush.msra.mxu0 %v300_v30  ;;  %712 = vmatpush.msra.mxu1 %v317_v31  ;;  %v358_v30 = vld [vmem:[%s1936_s1 + $0xa28] sm:$0xff]  ;;  %v357_v31 = vld [vmem:[%s1936_s1 + $0xa20] sm:$0xff] }
  0x93   :  { %733 = vmatpush.msra.mxu2 %v332_v32  ;;  %752 = vmatpush.msra.mxu3 %v349_v33  ;;  %v356_v32 = vld [vmem:[%s1936_s1 + $0xa18] sm:$0xff]  ;;  %v355_v33 = vld [vmem:[%s1936_s1 + $0xa10] sm:$0xff] }
  0x94   :  { %694 = vmatpush.msra.mxu0 %v299_v34  ;;  %713 = vmatpush.msra.mxu1 %v316_v35  ;;  %v354_v34 = vld [vmem:[%s1936_s1 + $0xa08] sm:$0xff]  ;;  %v353_v35 = vld [vmem:[%s1936_s1 + $0xa00] sm:$0xff] }
  0x95   :  { %734 = vmatpush.msra.mxu2 %v331_v36  ;;  %753 = vmatpush.msra.mxu3 %v348_v37  ;;  %v32_v36 = vld [vmem:[%s1935_s0 + $0xa0] sm:$0xff]  ;;  %s845_s0 = smov [#allocation2]  }
  0x96   :  { %695 = vmatpush.msra.mxu0 %v298_v38  ;;  %714 = vmatpush.msra.mxu1 %v315_v39  ;;  %s805_s1 = sshll.u32 %s845_s0, 4  ;;  %s806_s1 = int_to_ptr.vmem [resolvable:$true] %s805_s1 }
  0x97   :  { %735 = vmatpush.msra.mxu2 %v330_v40  ;;  %754 = vmatpush.msra.mxu3 %v347_v41 }
  0x98   :  { %696 = vmatpush.msra.mxu0 %v297_v42  ;;  %715 = vmatpush.msra.mxu1 %v314_v43 }
  0x99   :  { %736 = vmatpush.msra.mxu2 %v329_v44  ;;  %755 = vmatpush.msra.mxu3 %v346_v45 }
  0x9a   :  { %697 = vmatpush.msra.mxu0 %v296_v46  ;;  %716 = vmatpush.msra.mxu1 %v313_v47 }
  0x9b   :  { %737 = vmatpush.msra.mxu2 %v328_v48  ;;  %756 = vmatpush.msra.mxu3 %v345_v49 }
  0x9c   :  { %698 = vmatpush.msra.mxu0 %v295_v50  ;;  %717 = vmatpush.msra.mxu1 %v312_v51 }
  0x9d   :  { %738 = vmatpush.msra.mxu2 %v327_v52  ;;  %757 = vmatpush.msra.mxu3 %v344_v53 }
  0x9e   :  { %699 = vmatpush.msra.mxu0 %v294_v54  ;;  %718 = vmatpush.msra.mxu1 %v311_v55 }
  0x9f   :  { %739 = vmatpush.msra.mxu2 %v326_v56  ;;  %758 = vmatpush.msra.mxu3 %v343_v57 }
  0xa0   :  { %700 = vmatpush.msra.mxu0 %v293_v58  ;;  %719 = vmatpush.msra.mxu1 %v310_v59 }
  0xa1   :  { %740 = vmatpush.msra.mxu2 %v325_v60  ;;  %759 = vmatpush.msra.mxu3 %v342_v61 }
  0xa2   :  { %701 = vmatpush.msra.mxu0 %v292_v62  ;;  %720 = vmatpush.msra.mxu1 %v309_v63 }
  0xa3   :  { %741 = vmatpush.msra.mxu2 %v324_v0  ;;  %760 = vmatpush.msra.mxu3 %v341_v1 }
  0xa4   :  { %702 = vmatpush.msra.mxu0 %v291_v2  ;;  %721 = vmatpush.msra.mxu1 %v308_v3 }
  0xa5   :  { %742 = vmatpush.msra.mxu2 %v323_v4  ;;  %761 = vmatpush.msra.mxu3 %v340_v5 }
  0xa6   :  { %703 = vmatpush.msra.mxu0 %v290_v6  ;;  %722 = vmatpush.msra.mxu1 %v307_v7 }
  0xa7   :  { %743 = vmatpush.msra.mxu2 %v322_v8  ;;  %762 = vmatpush.msra.mxu3 %v339_v9 }
  0xa8   :  { %704 = vmatpush.msra.mxu0 %v289_v10  ;;  %723 = vmatpush.msra.mxu1 %v306_v11 }
  0xa9   :  { %744 = vmatpush.msra.mxu2 %v321_v12  ;;  %763 = vmatpush.msra.mxu3 %v338_v13 }
  0xaa   :  { %705 = vmatmul.f32.vlgmr.msra.gmra.mxu0 %v28_v14  ;;  %745 = vmatmul.f32.vlgmr.msra.gmra.mxu2 %v30_v15 }
  0xab   :  { %769 = vmatpush.msrb.mxu0 %v368_v16  ;;  %724 = vmatpush.msra.mxu1 %v305_v17 }
  0xac   :  { %764 = vmatpush.msra.mxu3 %v337_v18  ;;  %725 = vmatmul.f32.vlgmr.msra.gmra.mxu1 %v29_v19 }
  0xad   :  { %765 = vmatmul.f32.vlgmr.msra.gmra.mxu3 %v31_v20  ;;  %770 = vmatpush.msrb.mxu0 %v367_v21 }
  0xaf   :  { %771 = vmatpush.msrb.mxu0 %v366_v22 }
  0xb1   :  { %772 = vmatpush.msrb.mxu0 %v365_v23 }
  0xb3   :  { %773 = vmatpush.msrb.mxu0 %v364_v24 }
  0xb5   :  { %774 = vmatpush.msrb.mxu0 %v363_v25 }
  0xb7   :  { %775 = vmatpush.msrb.mxu0 %v362_v26 }
  0xb9   :  { %776 = vmatpush.msrb.mxu0 %v361_v27 }
  0xbb   :  { %777 = vmatpush.msrb.mxu0 %v360_v28 }
  0xbd   :  { %778 = vmatpush.msrb.mxu0 %v359_v29  ;;  %v386_v38 = vpop.f32.mrf.mxu0 }
  0xbf   :  { %779 = vmatpush.msrb.mxu0 %v358_v30 }
  0xc0   :  { %v406_v37 = vpop.f32.mrf.mxu1 }
  0xc1   :  { %780 = vmatpush.msrb.mxu0 %v357_v31  ;;  %v407_v39 = vadd.f32 %v406_v37, %v386_v38  ;;  %v426_v40 = vpop.f32.mrf.mxu2 }
  0xc3   :  { %781 = vmatpush.msrb.mxu0 %v356_v32  ;;  %v427_v41 = vadd.f32 %v426_v40, %v407_v39 }
  0xc4   :  { %v446_v42 = vpop.f32.mrf.mxu3 }
  0xc5   :  { %782 = vmatpush.msrb.mxu0 %v355_v33  ;;  %v447_v43 = vadd.f32 %v446_v42, %v427_v41 }
  0xc7   :  { %783 = vmatpush.msrb.mxu0 %v354_v34  ;;  %v466_v44 = vpop.f32.mrf.mxu0 }
  0xc8   :  { %v467_v45 = vadd.f32 %v466_v44, %v447_v43 }
  0xc9   :  { %784 = vmatpush.msrb.mxu0 %v353_v35 }
  0xca   :  { %785 = vmatmul.f32.vlgmr.msrb.gmra.mxu0 %v32_v36  ;;  %v486_v46 = vpop.f32.mrf.mxu1 }
  0xcb   :  { %v487_v47 = vadd.f32 %v486_v46, %v467_v45  ;;  %v506_v48 = vpop.f32.mrf.mxu2 }
  0xcd   :  { %v507_v49 = vadd.f32 %v506_v48, %v487_v47 }
  0xce   :  { %v526_v50 = vpop.f32.mrf.mxu3 }
  0xcf   :  { %v527_v52 = vadd.f32 %v526_v50, %v507_v49 }
  0xe3   :  { %v546_v51 = vpop.f32.mrf.mxu0 }
  0xe4   :  { %v547_v53 = vadd.f32 %v546_v51, %v527_v52 }
  0xe6   :  { %v566_v54 = vpop.f32.mrf.mxu1 }
  0xe7   :  { %v567_v56 = vadd.f32 %v566_v54, %v547_v53 }
  0xe9   :  { %v586_v55 = vpop.f32.mrf.mxu2 }
  0xea   :  { %v587_v57 = vadd.f32 %v586_v55, %v567_v56 }
  0xec   :  { %v606_v58 = vpop.f32.mrf.mxu3 }
  0xed   :  { %v607_v60 = vadd.f32 %v606_v58, %v587_v57 }
 0x105   :  { %v626_v59 = vpop.f32.mrf.mxu0 }
 0x106   :  { %v627_v61 = vadd.f32 %v626_v59, %v607_v60 }
 0x108   :  { %v646_v62 = vpop.f32.mrf.mxu1 }
 0x109   :  { %v647_v0 = vadd.f32 %v646_v62, %v627_v61 }
 0x10b   :  { %v666_v63 = vpop.f32.mrf.mxu2 }
 0x10c   :  { %v667_v1 = vadd.f32 %v666_v63, %v647_v0 }
 0x10e   :  { %v686_v2 = vpop.f32.mrf.mxu3 }
 0x10f   :  { %v687_v4 = vadd.f32 %v686_v2, %v667_v1 }
 0x127   :  { %v706_v3 = vpop.f32.mrf.mxu0 }
 0x128   :  { %v707_v5 = vadd.f32 %v706_v3, %v687_v4 }
 0x129   :  { %v726_v6 = vpop.f32.mrf.mxu1 }
 0x12a   :  { %v727_v8 = vadd.f32 %v726_v6, %v707_v5 }
 0x12d   :  { %v746_v7 = vpop.f32.mrf.mxu2 }
 0x12e   :  { %v747_v9 = vadd.f32 %v746_v7, %v727_v8 }
 0x130   :  { %v766_v10 = vpop.f32.mrf.mxu3 }
 0x131   :  { %v767_v11 = vadd.f32 %v766_v10, %v747_v9 }
 0x147   :  { %v786_v12 = vpop.f32.mrf.mxu0 }
 0x148   :  { %v787_v13 = vadd.f32 %v786_v12, %v767_v11 }
 0x14a   :  { %v790_v14 = vmul.f32 %v787_v13, %v787_v13  ;;  %v789_v20 = vmul.f32 0.5, %v787_v13 }
 0x14c   :  { %v791_v15 = vmul.f32 %v790_v14, %v787_v13 }
 0x14e   :  { %v792_v16 = vmul.f32 0.044715, %v791_v15 }
 0x150   :  { %v793_v17 = vadd.f32 %v792_v16, %v787_v13 }
 0x152   :  { %v794_v18 = vmul.f32 0.7978846, %v793_v17 }
 0x154   :  { %817 = vtanh.f32 %v794_v18 }
 0x15a   :  { %v818_v19 = vpop.eup %817 }
 0x15b   :  { %v796_v21 = vadd.f32 1.0, %v818_v19 }
 0x15d   :  { %v797_v22 = vmul.f32 %v796_v21, %v789_v20 }
 0x15f   :  { %799 = vst.msk [vmem:[#allocation2] sm:$0xff] %vm798_vm0, %v797_v22 }
 0x160   :  { %810 = dma.vmem_to_hbm [thread:$0]  %s806_s1, 128, %s808_s25, [#allocation3]  }
 0x161   :  { %843 = dma.done.wait [#allocation3], 128  }
 0x162   :  { %844 = vsyncadd [#allocation3], 4294967168 }
 0x163   :  { %815 = vsyncpa [#allocation3], 1 }

</bundles_post_ra>
